<compile_context>
chip_gen: v7x
topology: tpu7x:2x2x1
jax: 0.10.0
libtpu: 0.0.40
codegen_flags: <defaults>
</compile_context>

<pallas_src>
import functools

import jax
import jax.numpy as jnp
from jax import lax
from jax.experimental import pallas as pl
from jax.experimental.pallas import tpu as pltpu

LANES = 128
SUBLANES = 8
VREG_ELEMS = SUBLANES * LANES      # 1024 elements per f32 vreg
MAX_TILE_ROWS = 2048               # (2048, 128) f32 tile = 1 MiB


def _bce_dice_kernel(logits_ref, targets_ref, out_ref,
                     acc_bce, acc_int, acc_den,
                     *, num_valid_last, total, smooth):
    """Streaming accumulation of BCE sum, intersection and p+t denominator.

    acc_* : persistent VMEM (8, 128) f32 scratch (vreg-shaped partial sums).
    """
    i = pl.program_id(0)
    nprog = pl.num_programs(0)

    @pl.when(i == 0)
    def _():
        acc_bce[...] = jnp.zeros_like(acc_bce)
        acc_int[...] = jnp.zeros_like(acc_int)
        acc_den[...] = jnp.zeros_like(acc_den)

    x = logits_ref[...].astype(jnp.float32)
    t = targets_ref[...].astype(jnp.float32)
    rows = x.shape[0]                       # static; multiple of 8 by construction

    def fold(v):
        # (rows, 128) -> (8, 128): group whole (8,128) sublane tiles and add
        # them.  Pure VPU vreg adds; the one XLU reduce happens at finalize.
        return jnp.sum(v.reshape(rows // SUBLANES, SUBLANES, LANES), axis=0)

    def accum(xv, tv, mask=None):
        # e = exp(-|x|) reused for both softplus and sigmoid (one EUP exp).
        e = jnp.exp(-jnp.abs(xv))
        # numerically-stable BCE-with-logits (matches torch.nn.BCEWithLogitsLoss)
        bce = jnp.maximum(xv, 0.0) - xv * tv + jnp.log1p(e)
        inv = 1.0 / (1.0 + e)
        p = jnp.where(xv >= 0, inv, e * inv)          # sigmoid(x)
        if mask is not None:
            # selects (not multiplies) so garbage/NaN in padded lanes is dropped
            bce = jnp.where(mask, bce, 0.0)
            p = jnp.where(mask, p, 0.0)
            tv = jnp.where(mask, tv, 0.0)
        acc_bce[...] += fold(bce)
        acc_int[...] += fold(p * tv)
        acc_den[...] += fold(p + tv)

    # All tiles except the last: accumulate unmasked (no iota / compare cost).
    @pl.when(i < nprog - 1)
    def _():
        accum(x, t)

    # Last tile: mask the zero-padding / partial-block tail, then finalize.
    @pl.when(i == nprog - 1)
    def _():
        if num_valid_last == rows * LANES:
            accum(x, t)                     # tail is full: no mask needed
        else:
            lidx = (lax.broadcasted_iota(jnp.int32, (rows, LANES), 0) * LANES
                    + lax.broadcasted_iota(jnp.int32, (rows, LANES), 1))
            accum(x, t, lidx < num_valid_last)   # local index: no i32 overflow

        bce_sum = jnp.sum(acc_bce[...])
        inter = jnp.sum(acc_int[...])
        den = jnp.sum(acc_den[...])

        bce_loss = bce_sum / total
        dice = (2.0 * inter + smooth) / (den + smooth)
        out_ref[0, 0] = bce_loss + (1.0 - dice)


def bce_dice_loss(logits, targets, smooth=1.0):
    """BCEWithLogitsLoss(logits, targets) + DiceLoss(sigmoid(logits), targets)."""
    assert logits.shape == targets.shape
    total = int(logits.size)
    assert total > 0

    # Flatten in native dtype (cast happens inside the kernel, post-DMA).
    flat_l = jnp.reshape(logits, (-1,))
    flat_t = jnp.reshape(targets, (-1,))

    # Pad to a whole number of (8, 128) vregs so every tile folds cleanly.
    # Zero-copy when total % 1024 == 0.
    pad = (-total) % VREG_ELEMS
    if pad:
        # TODO(synk): avoid the full-array copy here by streaming the ragged
        # <1024-element tail through a separate small side buffer.
        flat_l = jnp.pad(flat_l, (0, pad))
        flat_t = jnp.pad(flat_t, (0, pad))
    rows = (total + pad) // LANES

    if rows <= MAX_TILE_ROWS:
        tile_rows = rows                # block == full array dims
        grid = 1
    else:
        tile_rows = MAX_TILE_ROWS       # (2048, 128) blocks; last may be partial
        grid = pl.cdiv(rows, MAX_TILE_ROWS)

    tile_elems = tile_rows * LANES
    num_valid_last = total - (grid - 1) * tile_elems    # static, in (0, tile_elems]

    slab_l = flat_l.reshape(rows, LANES)
    slab_t = flat_t.reshape(rows, LANES)

    kernel = functools.partial(
        _bce_dice_kernel,
        num_valid_last=int(num_valid_last),
        total=float(total),
        smooth=float(smooth),
    )

    # TODO(synk): on v7x, add a leading size-2 "parallel" grid axis with
    # per-core partial accumulators to use both TensorCores.
    out = pl.pallas_call(
        kernel,
        out_shape=jax.ShapeDtypeStruct((1, 1), jnp.float32),
        grid_spec=pltpu.PrefetchScalarGridSpec(
            num_scalar_prefetch=0,
            grid=(grid,),
            in_specs=[
                pl.BlockSpec((tile_rows, LANES), lambda i: (i, 0)),
                pl.BlockSpec((tile_rows, LANES), lambda i: (i, 0)),
            ],
            out_specs=pl.BlockSpec(memory_space=pltpu.SMEM),
            scratch_shapes=[
                pltpu.VMEM((SUBLANES, LANES), jnp.float32),  # bce partial sums
                pltpu.VMEM((SUBLANES, LANES), jnp.float32),  # intersection
                pltpu.VMEM((SUBLANES, LANES), jnp.float32),  # sum(p) + sum(t)
            ],
        ),
        compiler_params=pltpu.CompilerParams(
            dimension_semantics=("arbitrary",),
        ),
    )(slab_l, slab_t)
    return out[0, 0]


def _reference(logits, targets, smooth=1.0):
    x = logits.astype(jnp.float32)
    t = targets.astype(jnp.float32)
    bce = jnp.mean(jnp.maximum(x, 0.0) - x * t + jnp.log1p(jnp.exp(-jnp.abs(x))))
    p = jax.nn.sigmoid(x).reshape(-1)
    tf = t.reshape(-1)
    inter = jnp.sum(p * tf)
    dice = (2.0 * inter + smooth) / (jnp.sum(p) + jnp.sum(tf) + smooth)
    return bce + (1.0 - dice)


if __name__ == "__main__":
    key = jax.random.PRNGKey(0)
    k1, k2 = jax.random.split(key)
    # shapes consistent with a segmentation head: batch=2, channels=4, 16x16
    logits = jax.random.normal(k1, (2, 4, 16, 16), dtype=jnp.float32)
    targets = (jax.random.uniform(k2, (2, 4, 16, 16)) > 0.5).astype(jnp.float32)

    loss = jax.block_until_ready(bce_dice_loss(logits, targets))
    ref = jax.block_until_ready(_reference(logits, targets))
    assert jnp.allclose(loss, ref, rtol=1e-5, atol=1e-5), (loss, ref)
    print("KERNEL_OK")
</pallas_src>

<mosaic_0001>
module attributes {stable_mosaic.version = 11 : i64} {
  func.func @_bce_dice_kernel(%arg0: i32, %arg1: memref<16x128xf32, #tpu.memory_space<vmem>>, %arg2: memref<16x128xf32, #tpu.memory_space<vmem>>, %arg3: memref<1x1xf32, #tpu.memory_space<smem>>, %arg4: memref<8x128xf32, #tpu.memory_space<vmem>>, %arg5: memref<8x128xf32, #tpu.memory_space<vmem>>, %arg6: memref<8x128xf32, #tpu.memory_space<vmem>>) attributes {dimension_semantics = [#tpu.dimension_semantics<arbitrary>], iteration_bounds = array<i64: 1>, scalar_prefetch = 0 : i64, scratch_operands = 3 : i64, tpu.core_type = #tpu.core_type<tc>, window_params = [{transform_indices = @transform_0, window_bounds = array<i64: 16, 128>}, {transform_indices = @transform_1, window_bounds = array<i64: 16, 128>}, {transform_indices = @transform_2, window_bounds = array<i64: 1, 1>}]} {
    %c0_i32 = arith.constant 0 : i32
    %0 = arith.cmpi eq, %arg0, %c0_i32 : i32
    %1 = arith.extui %0 : i1 to i32
    %c0_i32_0 = arith.constant 0 : i32
    %2 = arith.cmpi ne, %1, %c0_i32_0 : i32
    scf.if %2 {
      %cst = arith.constant 0.000000e+00 : f32
      %11 = vector.broadcast %cst : f32 to vector<8x128xf32>
      %c0_8 = arith.constant 0 : index
      %c0_9 = arith.constant 0 : index
      %12 = vector.load %arg4[%c0_8, %c0_9] : memref<8x128xf32, #tpu.memory_space<vmem>>, vector<8x128xf32>
      tpu.vector_store %arg4[%c0_8, %c0_9], %11 {strides = array<i32>} : memref<8x128xf32, #tpu.memory_space<vmem>>, vector<8x128xf32>,
      %cst_10 = arith.constant 0.000000e+00 : f32
      %13 = vector.broadcast %cst_10 : f32 to vector<8x128xf32>
      %c0_11 = arith.constant 0 : index
      %c0_12 = arith.constant 0 : index
      %14 = vector.load %arg5[%c0_11, %c0_12] : memref<8x128xf32, #tpu.memory_space<vmem>>, vector<8x128xf32>
      tpu.vector_store %arg5[%c0_11, %c0_12], %13 {strides = array<i32>} : memref<8x128xf32, #tpu.memory_space<vmem>>, vector<8x128xf32>,
      %cst_13 = arith.constant 0.000000e+00 : f32
      %15 = vector.broadcast %cst_13 : f32 to vector<8x128xf32>
      %c0_14 = arith.constant 0 : index
      %c0_15 = arith.constant 0 : index
      %16 = vector.load %arg6[%c0_14, %c0_15] : memref<8x128xf32, #tpu.memory_space<vmem>>, vector<8x128xf32>
      tpu.vector_store %arg6[%c0_14, %c0_15], %15 {strides = array<i32>} : memref<8x128xf32, #tpu.memory_space<vmem>>, vector<8x128xf32>,
    } else {
    }
    %c0 = arith.constant 0 : index
    %c0_1 = arith.constant 0 : index
    %3 = vector.load %arg1[%c0, %c0_1] : memref<16x128xf32, #tpu.memory_space<vmem>>, vector<16x128xf32>
    %c0_2 = arith.constant 0 : index
    %c0_3 = arith.constant 0 : index
    %4 = vector.load %arg2[%c0_2, %c0_3] : memref<16x128xf32, #tpu.memory_space<vmem>>, vector<16x128xf32>
    %c0_i32_4 = arith.constant 0 : i32
    %5 = arith.cmpi slt, %arg0, %c0_i32_4 : i32
    %6 = arith.extui %5 : i1 to i32
    %c0_i32_5 = arith.constant 0 : i32
    %7 = arith.cmpi ne, %6, %c0_i32_5 : i32
    scf.if %7 {
      %11 = math.absf %3 : vector<16x128xf32>
      %cst = arith.constant 0.000000e+00 : f32
      %12 = vector.broadcast %cst : f32 to vector<16x128xf32>
      %13 = arith.subf %12, %11 : vector<16x128xf32>
      %14 = math.exp %13 : vector<16x128xf32>
      %cst_8 = arith.constant 0.000000e+00 : f32
      %15 = vector.broadcast %cst_8 : f32 to vector<16x128xf32>
      %16 = arith.maximumf %3, %15 : vector<16x128xf32>
      %17 = arith.mulf %3, %4 : vector<16x128xf32>
      %18 = arith.subf %16, %17 : vector<16x128xf32>
      %19 = math.log1p %14 : vector<16x128xf32>
      %20 = arith.addf %18, %19 : vector<16x128xf32>
      %cst_9 = arith.constant 1.000000e+00 : f32
      %21 = vector.broadcast %cst_9 : f32 to vector<16x128xf32>
      %22 = arith.addf %21, %14 : vector<16x128xf32>
      %cst_10 = arith.constant 1.000000e+00 : f32
      %23 = vector.broadcast %cst_10 : f32 to vector<16x128xf32>
      %24 = arith.divf %23, %22 : vector<16x128xf32>
      %cst_11 = arith.constant 0.000000e+00 : f32
      %25 = vector.broadcast %cst_11 : f32 to vector<16x128xf32>
      %26 = arith.cmpf oge, %3, %25 : vector<16x128xf32>
      %27 = arith.mulf %14, %24 : vector<16x128xf32>
      %28 = arith.select %26, %24, %27 : vector<16x128xi1>, vector<16x128xf32>
      %c0_12 = arith.constant 0 : index
      %c0_13 = arith.constant 0 : index
      %29 = vector.load %arg4[%c0_12, %c0_13] : memref<8x128xf32, #tpu.memory_space<vmem>>, vector<8x128xf32>
      %30 = vector.shape_cast %20 : vector<16x128xf32> to vector<2x8x128xf32>
      %cst_14 = arith.constant dense<0.000000e+00> : vector<8x128xf32>
      %31 = vector.multi_reduction <add>, %30, %cst_14 [0] : vector<2x8x128xf32> to vector<8x128xf32>
      %32 = arith.addf %29, %31 : vector<8x128xf32>
      %c0_15 = arith.constant 0 : index
      %c0_16 = arith.constant 0 : index
      %33 = vector.load %arg4[%c0_15, %c0_16] : memref<8x128xf32, #tpu.memory_space<vmem>>, vector<8x128xf32>
      tpu.vector_store %arg4[%c0_15, %c0_16], %32 {strides = array<i32>} : memref<8x128xf32, #tpu.memory_space<vmem>>, vector<8x128xf32>,
      %c0_17 = arith.constant 0 : index
      %c0_18 = arith.constant 0 : index
      %34 = vector.load %arg5[%c0_17, %c0_18] : memref<8x128xf32, #tpu.memory_space<vmem>>, vector<8x128xf32>
      %35 = arith.mulf %28, %4 : vector<16x128xf32>
      %36 = vector.shape_cast %35 : vector<16x128xf32> to vector<2x8x128xf32>
      %cst_19 = arith.constant dense<0.000000e+00> : vector<8x128xf32>
      %37 = vector.multi_reduction <add>, %36, %cst_19 [0] : vector<2x8x128xf32> to vector<8x128xf32>
      %38 = arith.addf %34, %37 : vector<8x128xf32>
      %c0_20 = arith.constant 0 : index
      %c0_21 = arith.constant 0 : index
      %39 = vector.load %arg5[%c0_20, %c0_21] : memref<8x128xf32, #tpu.memory_space<vmem>>, vector<8x128xf32>
      tpu.vector_store %arg5[%c0_20, %c0_21], %38 {strides = array<i32>} : memref<8x128xf32, #tpu.memory_space<vmem>>, vector<8x128xf32>,
      %c0_22 = arith.constant 0 : index
      %c0_23 = arith.constant 0 : index
      %40 = vector.load %arg6[%c0_22, %c0_23] : memref<8x128xf32, #tpu.memory_space<vmem>>, vector<8x128xf32>
      %41 = arith.addf %28, %4 : vector<16x128xf32>
      %42 = vector.shape_cast %41 : vector<16x128xf32> to vector<2x8x128xf32>
      %cst_24 = arith.constant dense<0.000000e+00> : vector<8x128xf32>
      %43 = vector.multi_reduction <add>, %42, %cst_24 [0] : vector<2x8x128xf32> to vector<8x128xf32>
      %44 = arith.addf %40, %43 : vector<8x128xf32>
      %c0_25 = arith.constant 0 : index
      %c0_26 = arith.constant 0 : index
      %45 = vector.load %arg6[%c0_25, %c0_26] : memref<8x128xf32, #tpu.memory_space<vmem>>, vector<8x128xf32>
      tpu.vector_store %arg6[%c0_25, %c0_26], %44 {strides = array<i32>} : memref<8x128xf32, #tpu.memory_space<vmem>>, vector<8x128xf32>,
    } else {
    }
    %c0_i32_6 = arith.constant 0 : i32
    %8 = arith.cmpi eq, %arg0, %c0_i32_6 : i32
    %9 = arith.extui %8 : i1 to i32
    %c0_i32_7 = arith.constant 0 : i32
    %10 = arith.cmpi ne, %9, %c0_i32_7 : i32
    scf.if %10 {
      %11 = math.absf %3 : vector<16x128xf32>
      %cst = arith.constant 0.000000e+00 : f32
      %12 = vector.broadcast %cst : f32 to vector<16x128xf32>
      %13 = arith.subf %12, %11 : vector<16x128xf32>
      %14 = math.exp %13 : vector<16x128xf32>
      %cst_8 = arith.constant 0.000000e+00 : f32
      %15 = vector.broadcast %cst_8 : f32 to vector<16x128xf32>
      %16 = arith.maximumf %3, %15 : vector<16x128xf32>
      %17 = arith.mulf %3, %4 : vector<16x128xf32>
      %18 = arith.subf %16, %17 : vector<16x128xf32>
      %19 = math.log1p %14 : vector<16x128xf32>
      %20 = arith.addf %18, %19 : vector<16x128xf32>
      %cst_9 = arith.constant 1.000000e+00 : f32
      %21 = vector.broadcast %cst_9 : f32 to vector<16x128xf32>
      %22 = arith.addf %21, %14 : vector<16x128xf32>
      %cst_10 = arith.constant 1.000000e+00 : f32
      %23 = vector.broadcast %cst_10 : f32 to vector<16x128xf32>
      %24 = arith.divf %23, %22 : vector<16x128xf32>
      %cst_11 = arith.constant 0.000000e+00 : f32
      %25 = vector.broadcast %cst_11 : f32 to vector<16x128xf32>
      %26 = arith.cmpf oge, %3, %25 : vector<16x128xf32>
      %27 = arith.mulf %14, %24 : vector<16x128xf32>
      %28 = arith.select %26, %24, %27 : vector<16x128xi1>, vector<16x128xf32>
      %c0_12 = arith.constant 0 : index
      %c0_13 = arith.constant 0 : index
      %29 = vector.load %arg4[%c0_12, %c0_13] : memref<8x128xf32, #tpu.memory_space<vmem>>, vector<8x128xf32>
      %30 = vector.shape_cast %20 : vector<16x128xf32> to vector<2x8x128xf32>
      %cst_14 = arith.constant dense<0.000000e+00> : vector<8x128xf32>
      %31 = vector.multi_reduction <add>, %30, %cst_14 [0] : vector<2x8x128xf32> to vector<8x128xf32>
      %32 = arith.addf %29, %31 : vector<8x128xf32>
      %c0_15 = arith.constant 0 : index
      %c0_16 = arith.constant 0 : index
      %33 = vector.load %arg4[%c0_15, %c0_16] : memref<8x128xf32, #tpu.memory_space<vmem>>, vector<8x128xf32>
      tpu.vector_store %arg4[%c0_15, %c0_16], %32 {strides = array<i32>} : memref<8x128xf32, #tpu.memory_space<vmem>>, vector<8x128xf32>,
      %c0_17 = arith.constant 0 : index
      %c0_18 = arith.constant 0 : index
      %34 = vector.load %arg5[%c0_17, %c0_18] : memref<8x128xf32, #tpu.memory_space<vmem>>, vector<8x128xf32>
      %35 = arith.mulf %28, %4 : vector<16x128xf32>
      %36 = vector.shape_cast %35 : vector<16x128xf32> to vector<2x8x128xf32>
      %cst_19 = arith.constant dense<0.000000e+00> : vector<8x128xf32>
      %37 = vector.multi_reduction <add>, %36, %cst_19 [0] : vector<2x8x128xf32> to vector<8x128xf32>
      %38 = arith.addf %34, %37 : vector<8x128xf32>
      %c0_20 = arith.constant 0 : index
      %c0_21 = arith.constant 0 : index
      %39 = vector.load %arg5[%c0_20, %c0_21] : memref<8x128xf32, #tpu.memory_space<vmem>>, vector<8x128xf32>
      tpu.vector_store %arg5[%c0_20, %c0_21], %38 {strides = array<i32>} : memref<8x128xf32, #tpu.memory_space<vmem>>, vector<8x128xf32>,
      %c0_22 = arith.constant 0 : index
      %c0_23 = arith.constant 0 : index
      %40 = vector.load %arg6[%c0_22, %c0_23] : memref<8x128xf32, #tpu.memory_space<vmem>>, vector<8x128xf32>
      %41 = arith.addf %28, %4 : vector<16x128xf32>
      %42 = vector.shape_cast %41 : vector<16x128xf32> to vector<2x8x128xf32>
      %cst_24 = arith.constant dense<0.000000e+00> : vector<8x128xf32>
      %43 = vector.multi_reduction <add>, %42, %cst_24 [0] : vector<2x8x128xf32> to vector<8x128xf32>
      %44 = arith.addf %40, %43 : vector<8x128xf32>
      %c0_25 = arith.constant 0 : index
      %c0_26 = arith.constant 0 : index
      %45 = vector.load %arg6[%c0_25, %c0_26] : memref<8x128xf32, #tpu.memory_space<vmem>>, vector<8x128xf32>
      tpu.vector_store %arg6[%c0_25, %c0_26], %44 {strides = array<i32>} : memref<8x128xf32, #tpu.memory_space<vmem>>, vector<8x128xf32>,
      %c0_27 = arith.constant 0 : index
      %c0_28 = arith.constant 0 : index
      %46 = vector.load %arg4[%c0_27, %c0_28] : memref<8x128xf32, #tpu.memory_space<vmem>>, vector<8x128xf32>
      %47 = vector.shape_cast %46 : vector<8x128xf32> to vector<1x8x128xf32>
      %cst_29 = arith.constant dense<0.000000e+00> : vector<1xf32>
      %48 = vector.multi_reduction <add>, %47, %cst_29 [1, 2] : vector<1x8x128xf32> to vector<1xf32>
      %49 = vector.shape_cast %48 : vector<1xf32> to vector<1x1x1xf32>
      %50 = vector.extract %49[0, 0, 0] : f32 from vector<1x1x1xf32>
      %c0_30 = arith.constant 0 : index
      %c0_31 = arith.constant 0 : index
      %51 = vector.load %arg5[%c0_30, %c0_31] : memref<8x128xf32, #tpu.memory_space<vmem>>, vector<8x128xf32>
      %52 = vector.shape_cast %51 : vector<8x128xf32> to vector<1x8x128xf32>
      %cst_32 = arith.constant dense<0.000000e+00> : vector<1xf32>
      %53 = vector.multi_reduction <add>, %52, %cst_32 [1, 2] : vector<1x8x128xf32> to vector<1xf32>
      %54 = vector.shape_cast %53 : vector<1xf32> to vector<1x1x1xf32>
      %55 = vector.extract %54[0, 0, 0] : f32 from vector<1x1x1xf32>
      %c0_33 = arith.constant 0 : index
      %c0_34 = arith.constant 0 : index
      %56 = vector.load %arg6[%c0_33, %c0_34] : memref<8x128xf32, #tpu.memory_space<vmem>>, vector<8x128xf32>
      %57 = vector.shape_cast %56 : vector<8x128xf32> to vector<1x8x128xf32>
      %cst_35 = arith.constant dense<0.000000e+00> : vector<1xf32>
      %58 = vector.multi_reduction <add>, %57, %cst_35 [1, 2] : vector<1x8x128xf32> to vector<1xf32>
      %59 = vector.shape_cast %58 : vector<1xf32> to vector<1x1x1xf32>
      %60 = vector.extract %59[0, 0, 0] : f32 from vector<1x1x1xf32>
      %cst_36 = arith.constant 2.048000e+03 : f32
      %61 = arith.divf %50, %cst_36 : f32
      %cst_37 = arith.constant 2.000000e+00 : f32
      %62 = arith.mulf %cst_37, %55 : f32
      %cst_38 = arith.constant 1.000000e+00 : f32
      %63 = arith.addf %62, %cst_38 : f32
      %cst_39 = arith.constant 1.000000e+00 : f32
      %64 = arith.addf %60, %cst_39 : f32
      %65 = arith.divf %63, %64 : f32
      %cst_40 = arith.constant 1.000000e+00 : f32
      %66 = arith.subf %cst_40, %65 : f32
      %67 = arith.addf %61, %66 : f32
      %c0_41 = arith.constant 0 : index
      %c0_42 = arith.constant 0 : index
      %68 = memref.load %arg3[%c0_41, %c0_42] : memref<1x1xf32, #tpu.memory_space<smem>>
      memref.store %67, %arg3[%c0_41, %c0_42] : memref<1x1xf32, #tpu.memory_space<smem>>
    } else {
    }
    return
  }
  func.func @transform_0(%arg0: i32) -> (i32, i32) {
    %c0_i32 = arith.constant 0 : i32
    %c0_i32_0 = arith.constant 0 : i32
    return %arg0, %c0_i32 : i32, i32
  }
  func.func @transform_1(%arg0: i32) -> (i32, i32) {
    %c0_i32 = arith.constant 0 : i32
    %c0_i32_0 = arith.constant 0 : i32
    return %arg0, %c0_i32 : i32, i32
  }
  func.func @transform_2(%arg0: i32) -> (i32, i32) {
    %c0_i32 = arith.constant 0 : i32
    %c0_i32_0 = arith.constant 0 : i32
    %c0_i32_1 = arith.constant 0 : i32
    return %c0_i32, %c0_i32_0 : i32, i32
  }
}

</mosaic_0001>

<bundles_post_ra>
// kernel: tpu_custom_call.1
= control target key start
LH: loop header
LB: loop body
LE: loop exit
PB: predicated region body
PF: predicated region fallthrough
CT: control target
= control target key end

     0   :  { %7 = vsyncpa [#allocation6], 0  ;;  %s384_s0 = inlined_call_operand.hbm [shape: f32[16,128], index: 0, kind: input, shape index: {}]   ;;  %s385_s1 = inlined_call_operand.hbm [shape: f32[16,128], index: 1, kind: input, shape index: {}]   ;;  %s386_s2 = inlined_call_operand.hbm [shape: f32[1,1], index: 2, kind: output, shape index: {}]  }
   0x1   :  { %8 = vsyncpa [#allocation9], 0 }
   0x2   :  { %9 = vsyncpa [#allocation7], 0  ;;  %s328_s9 = smov [#allocation5]   ;;  %s268_s13 = scalar_lea.hbm %s384_s0, 256 }
   0x3   :  { %s15_s10 = sshll.u32 %s328_s9, 4  ;;  %p269_p0 = scmp.ne.s32.totalorder %s384_s0, %s268_s13  ;;  %s16_s10 = int_to_ptr.vmem [resolvable:$true] %s15_s10 }
   0x4   :  { %p272_p1 = scmp.lt.u32.totalorder %s268_s13, %s384_s0 }
   0x6   :  { %p274_p2 = pnand %p272_p1, %p269_p0 }
   0x8   :  { %277 = shalt.err (!%p274_p2)
}
   0x9   :  { %s278_s18 = scalar_lea.vmem %s16_s10, 256  ;;  %p283_p4 = scmp.lt.s32.totalorder %s16_s10, %s16_s10 }
   0xa   :  { %p279_p3 = scmp.ne.s32.totalorder %s16_s10, %s278_s18  ;;  %p284_p5 = scmp.lt.s32.totalorder %s278_s18, %s278_s18 }
   0xc   :  { %p285_p6 = por %p284_p5, %p283_p4 }
   0xe   :  { %p286_p7 = pnand %p285_p6, %p279_p3 }
  0x10   :  { %289 = shalt.err (!%p286_p7)
}
  0x11   :  { %s329_s19 = smov 128   ;;  %s330_s20 = smov 8  }
  0x12   :  { %21 = dma.hbm_to_vmem [thread:$0]  %s384_s0, 256, %s16_s10, [#allocation6], %s329_s19, %s329_s19, %s330_s20  }
  0x13   :  { %s331_s23 = smov [#allocation8]   ;;  %s290_s27 = scalar_lea.hbm %s385_s1, 256 }
  0x14   :  { %s27_s24 = sshll.u32 %s331_s23, 4  ;;  %p291_p8 = scmp.ne.s32.totalorder %s385_s1, %s290_s27  ;;  %s28_s24 = int_to_ptr.vmem [resolvable:$true] %s27_s24 }
  0x15   :  { %p294_p9 = scmp.lt.u32.totalorder %s290_s27, %s385_s1 }
  0x17   :  { %p296_p10 = pnand %p294_p9, %p291_p8 }
  0x19   :  { %299 = shalt.err (!%p296_p10)
}
  0x1a   :  { %s300_s4 = scalar_lea.vmem %s28_s24, 256  ;;  %p305_p12 = scmp.lt.s32.totalorder %s28_s24, %s28_s24 }
  0x1b   :  { %p301_p11 = scmp.ne.s32.totalorder %s28_s24, %s300_s4  ;;  %p306_p13 = scmp.lt.s32.totalorder %s300_s4, %s300_s4 }
  0x1d   :  { %p307_p0 = por %p306_p13, %p305_p12 }
  0x1f   :  { %p308_p1 = pnand %p307_p0, %p301_p11 }
  0x21   :  { %311 = shalt.err (!%p308_p1)
}
  0x22   :  { %33 = dma.hbm_to_vmem [thread:$0]  %s385_s1, 256, %s28_s24, [#allocation9], %s329_s19, %s329_s19, %s330_s20  }
  0x23   :  { %322 = dma.done.wait [#allocation6], 256  }
  0x24   :  { %323 = vsyncadd [#allocation6], 4294967040 }
  0x25   :  { %324 = dma.done.wait [#allocation9], 256  }
  0x26   :  { %325 = vsyncadd [#allocation9], 4294967040  ;;  %v47_v0 = vld [vmem:[#allocation5] sm:$0xff]  ;;  %v48_v1 = vld [vmem:[#allocation5 + $0x8] sm:$0xff]  ;;  %s312_s18 = scalar_lea.hbm %s386_s2, 16 }
  0x27   :  { %v120_v2 = vand.u32 2147483647, %v47_v0  ;;  %v121_v3 = vand.u32 2147483647, %v48_v1  ;;  %v49_v14 = vld [vmem:[#allocation8] sm:$0xff]  ;;  %v50_v15 = vld [vmem:[#allocation8 + $0x8] sm:$0xff]  ;;  %p313_p2 = scmp.ne.s32.totalorder %s386_s2, %s312_s18  ;;  %p316_p3 = scmp.lt.u32.totalorder %s312_s18, %s386_s2 }
  0x28   :  { %v128_v17 = vmax.f32 %v47_v0, 0.0  ;;  %v130_v18 = vmul.f32 %v49_v14, %v47_v0  ;;  %v129_v21 = vmax.f32 %v48_v1, 0.0  ;;  %v131_v22 = vmul.f32 %v50_v15, %v48_v1 }
  0x29   :  { %v122_v4 = vsub.f32 0.0, %v120_v2  ;;  %v123_v5 = vsub.f32 0.0, %v121_v3  ;;  %vm160_vm0 = vcmp.ge.f32.partialorder %v47_v0, 0.0  ;;  %vm161_vm1 = vcmp.ge.f32.partialorder %v48_v1, 0.0  ;;  %p318_p4 = pnand %p316_p3, %p313_p2 }
  0x2a   :  { %v132_v30 = vsub.f32 %v128_v17, %v130_v18  ;;  %v133_v34 = vsub.f32 %v129_v21, %v131_v22 }
  0x2b   :  { %v124_v6 = vmul.f32 1.442695, %v122_v4  ;;  %v126_v7 = vmul.f32 1.442695, %v123_v5 }
  0x2d   :  { %254 = vpow2.f32 %v124_v6 }
  0x2e   :  { %256 = vpow2.f32 %v126_v7 }
  0x37   :  { %v255_v8 = vpop.eup %254 }
  0x38   :  { %v257_v9 = vpop.eup %256  ;;  %v134_v10 = vadd.f32 1.0, %v255_v8  ;;  %v137_v12 = vmul.f32 -0.5, %v255_v8  ;;  %v140_v19 = vand.u32 2147483647, %v255_v8 }
  0x39   :  { %v143_v11 = vadd.f32 1.0, %v257_v9  ;;  %v146_v13 = vmul.f32 -0.5, %v257_v9  ;;  %v149_v23 = vand.u32 2147483647, %v257_v9 }
  0x3a   :  { %258 = vrcp.f32 %v134_v10  ;;  %v138_v16 = vadd.f32 1.0, %v137_v12  ;;  %vm141_vm2 = vcmp.lt.f32.partialorder %v140_v19, 0.0004427343 }
  0x3b   :  { %260 = vrcp.f32 %v143_v11  ;;  %v147_v20 = vadd.f32 1.0, %v146_v13  ;;  %vm150_vm3 = vcmp.lt.f32.partialorder %v149_v23, 0.0004427343 }
  0x3c   :  { %262 = vlog2.f32 %v134_v10  ;;  %v139_v27 = vmul.f32 %v255_v8, %v138_v16 }
  0x3d   :  { %264 = vlog2.f32 %v143_v11  ;;  %v148_v31 = vmul.f32 %v257_v9, %v147_v20 }
  0x44   :  { %v259_v24 = vpop.eup %258 }
  0x45   :  { %v261_v25 = vpop.eup %260  ;;  %v162_v26 = vmul.f32 %v259_v24, %v255_v8 }
  0x46   :  { %v263_v28 = vpop.eup %262  ;;  %v163_v29 = vmul.f32 %v261_v25, %v257_v9 }
  0x47   :  { %v265_v32 = vpop.eup %264  ;;  %v164_v33 = vsel %vm160_vm0, %v259_v24, %v162_v26  ;;  %v136_v35 = vmul.f32 0.6931472, %v263_v28 }
  0x48   :  { %v165_v36 = vsel %vm161_vm1, %v261_v25, %v163_v29  ;;  %v177_v37 = vadd.f32 %v164_v33, %v49_v14  ;;  %v145_v38 = vmul.f32 0.6931472, %v265_v32  ;;  %v171_v45 = vmul.f32 %v164_v33, %v49_v14 }
  0x49   :  { %v178_v39 = vadd.f32 %v165_v36, %v50_v15  ;;  %v142_v40 = vsel %vm141_vm2, %v139_v27, %v136_v35  ;;  %v172_v46 = vmul.f32 %v165_v36, %v50_v15 }
  0x4a   :  { %v151_v41 = vsel %vm150_vm3, %v148_v31, %v145_v38  ;;  %v152_v42 = vadd.f32 %v142_v40, %v132_v30 }
  0x4b   :  { %v179_v43 = vadd.f32 %v178_v39, %v177_v37  ;;  %v153_v44 = vadd.f32 %v151_v41, %v133_v34  ;;  %v173_v48 = vadd.f32 %v172_v46, %v171_v45 }
  0x4d   :  { %203 = vadd.xlane.f32.xlu1 %v179_v43  ;;  %v167_v47 = vadd.f32 %v153_v44, %v152_v42 }
  0x4f   :  { %183 = vadd.xlane.f32.xlu0 %v167_v47 }
  0x53   :  { %193 = vadd.xlane.f32.xlu0 %v173_v48 }
  0xda   :  { %v204_v49 = vpop.xlane.xlu1 %203 }
  0xdb   :  { %v205_v50 = vrot.slane %v204_v49, 4 }
  0xdc   :  { %v184_v51 = vpop.xlane.xlu0 %183 }
  0xdd   :  { %v206_v52 = vadd.f32 %v205_v50, %v204_v49  ;;  %v185_v53 = vrot.slane %v184_v51, 4 }
  0xdf   :  { %v186_v54 = vadd.f32 %v185_v53, %v184_v51  ;;  %v207_v55 = vrot.slane %v206_v52, 2 }
  0xe0   :  { %v194_v56 = vpop.xlane.xlu0 %193 }
  0xe1   :  { %v187_v57 = vrot.slane %v186_v54, 2  ;;  %v195_v58 = vrot.slane %v194_v56, 4  ;;  %v208_v61 = vadd.f32 %v207_v55, %v206_v52 }
  0xe3   :  { %v196_v59 = vadd.f32 %v195_v58, %v194_v56  ;;  %v188_v60 = vadd.f32 %v187_v57, %v186_v54  ;;  %v209_v2 = vrot.slane %v208_v61, 1 }
  0xe5   :  { %v197_v62 = vrot.slane %v196_v59, 2  ;;  %v189_v63 = vrot.slane %v188_v60, 1  ;;  %v210_v5 = vadd.f32 %v209_v2, %v208_v61 }
  0xe7   :  { %v198_v0 = vadd.f32 %v197_v62, %v196_v59  ;;  %v190_v1 = vadd.f32 %v189_v63, %v188_v60 }
  0xe9   :  { %241 = vpush %v190_v1  ;;  %v199_v3 = vrot.slane %v198_v0, 1 }
  0xeb   :  { %v200_v4 = vadd.f32 %v199_v3, %v198_v0 }
  0xed   :  { %243 = vpush %v200_v4 }
  0xee   :  { %245 = vpush %v210_v5 }
 0x11a   :  { %s242_s1 = spop %241 }
 0x11b   :  { %s214_s13 = smul.f32 0.00048828125, %s242_s1 }
 0x11e   :  { %s244_s6 = spop %243 }
 0x11f   :  { %s246_s7 = spop %245  ;;  %s215_s9 = smul.f32 2.0, %s244_s6 }
 0x120   :  { %s217_s8 = sadd.f32 1.0, %s246_s7 }
 0x121   :  { %s216_s10 = sadd.f32 1.0, %s215_s9 }
 0x122   :  { %v218_v6 = vstv %s217_s8 }
 0x123   :  { %266 = vrcp.f32 %v218_v6 }
 0x12d   :  { %v267_v7 = vpop.eup %266 }
 0x12e   :  { %247 = vpush %v267_v7 }
 0x15f   :  { %s248_s11 = spop %247 }
 0x160   :  { %s221_s12 = smul.f32 %s248_s11, %s216_s10 }
 0x162   :  { %s222_s14 = ssub.f32 1.0, %s221_s12 }
 0x164   :  { %s223_s15 = sadd.f32 %s222_s14, %s214_s13 }
 0x166   :  { %225 = sst [smem:[#allocation10]] %s223_s15 }
 0x167   :  { %321 = shalt.err (!%p318_p4)
}
 0x168   :  { %s332_s23 = smov [#allocation10]  }
 0x169   :  { %233 = dma.smem_to_hbm %s332_s23, 16, %s386_s2, [#allocation7]  }
 0x16a   :  { %326 = dma.done.wait [#allocation7], 16  }
 0x16b   :  { %327 = vsyncadd [#allocation7], 4294967280 }
 0x16c   :  { %237 = sfence }
 0x16d   :  { %238 = vsyncpa [#allocation6], 1 }
 0x16e   :  { %239 = vsyncpa [#allocation9], 1 }
 0x16f   :  { %240 = vsyncpa [#allocation7], 1 }

</bundles_post_ra>
